<compile_context>
chip_gen: v6e
topology: v6e:2x2x1
jax: 0.10.0
libtpu: 0.0.40
codegen_flags: <defaults>
</compile_context>

<pallas_src>
import random
import numpy as np
import jax
import jax.numpy as jnp
from jax.experimental import pallas as pl
from jax.experimental.pallas import tpu as pltpu

LANE = 128
B_ALIGN = 16          # bf16 sublane packing -> keep row tiles multiples of 16


def _round_up(x, m):
    return ((x + m - 1) // m) * m


def _pad2(x, rows, cols):
    r, c = x.shape
    if r == rows and c == cols:
        return x
    return jnp.pad(x, ((0, rows - r), (0, cols - c)))


def _device_kind():
    try:
        return jax.devices()[0].device_kind.lower()
    except Exception:
        return ""


def _select_row_tile(b_pad):
    """Per-generation batch tile: 128 on v5e, 256 on v6e/v7x; >=2 steps on v7x."""
    kind = _device_kind()
    cap = 128 if "v5" in kind else 256           # v6e/v7x MXU is 256 tall
    tb = min(cap, b_pad)
    if "v7" in kind and b_pad >= 2 * B_ALIGN and b_pad // tb < 2:
        # v7x has 2 TensorCores; keep the parallel axis >= 2 grid steps.
        tb = _round_up((b_pad + 1) // 2, B_ALIGN)
    return max(tb, B_ALIGN)


# ---------------------------- fused Pallas kernel ----------------------------

def _fused_sage_kernel(mask_ref, embed_ref, self_ref, inv_ref,
                       w_self_ref, w_agg_ref, out_ref, acc_ref):
    # mask_ref  : (TB, TU)   bf16   0/1 adjacency tile (zero-padded)
    # embed_ref : (TU, Dp)   bf16   previous-layer embeddings (zero-padded)
    # self_ref  : (TB, Dp)   bf16   self features (zero-padded)
    # inv_ref   : (TB, 1)    f32    1 / num_neighbors (0 for padded/empty rows)
    # w_self_ref: (Dp, DOp)  bf16   W_self^T (zero-padded)
    # w_agg_ref : (Dp, DOp)  bf16   W_agg^T  (zero-padded)
    # out_ref   : (TB, DOp)  bf16
    # acc_ref   : (TB, Dp)   f32    mask@embed accumulator across the U axis
    u = pl.program_id(1)

    @pl.when(u == 0)
    def _init():
        acc_ref[...] = jnp.zeros_like(acc_ref)

    acc_ref[...] += jnp.dot(mask_ref[...], embed_ref[...],
                            preferred_element_type=jnp.float32)

    @pl.when(u == pl.num_programs(1) - 1)
    def _finalize():
        # Mean aggregation via exact host-side 1/count (f32 elementwise: v5e-safe).
        agg = (acc_ref[...] * inv_ref[...]).astype(jnp.bfloat16)
        # Two 128-aligned MXU pushes instead of materializing concat([self, agg]).
        acc = jnp.dot(self_ref[...], w_self_ref[...],
                      preferred_element_type=jnp.float32)
        acc = acc + jnp.dot(agg, w_agg_ref[...],
                            preferred_element_type=jnp.float32)
        out_ref[...] = jnp.maximum(acc, 0.0).astype(out_ref.dtype)


def fused_sage_layer(mask, inv, embed, self_feats, w_self_p, w_agg_p):
    """relu(self @ Wself^T + ((mask@embed)*inv) @ Wagg^T), one pallas_call.

    Returns the padded (Bp, DOp) bf16 result; the caller slices only after the
    final layer (keeps the inter-layer handoff lane-dense and HBM-cheap).
    """
    B, U = mask.shape
    Dp, DOp = w_self_p.shape
    Ue, De = embed.shape
    assert De <= Dp and self_feats.shape[1] <= Dp and w_agg_p.shape == (Dp, DOp)

    Bp0 = _round_up(max(B, B_ALIGN), B_ALIGN)
    TB = _select_row_tile(Bp0)
    Bp = _round_up(Bp0, TB)

    # Unique-node axis: full block when small, otherwise 512-wide reduction tiles
    # so the VMEM footprint stays bounded (v7x: 64 MiB physical VMEM).
    Up = _round_up(max(U, Ue, LANE), LANE)
    TU = Up if Up <= 1024 else 512
    Up = _round_up(Up, TU)

    mask_p = _pad2(mask.astype(jnp.bfloat16), Bp, Up)
    embed_p = _pad2(embed.astype(jnp.bfloat16), Up, Dp)
    self_p = _pad2(self_feats.astype(jnp.bfloat16), Bp, Dp)
    inv_p = _pad2(inv.astype(jnp.float32), Bp, 1)

    # TODO(synk): if profiling shows the mask DMA exposed at large U, add
    # pipeline_mode=pl.Buffered(3) on the mask BlockSpec.
    out = pl.pallas_call(
        _fused_sage_kernel,
        out_shape=jax.ShapeDtypeStruct((Bp, DOp), jnp.bfloat16),
        grid=(Bp // TB, Up // TU),
        in_specs=[
            pl.BlockSpec((TB, TU), lambda i, u: (i, u)),     # mask (streamed)
            pl.BlockSpec((TU, Dp), lambda i, u: (u, 0)),     # embed (streamed U)
            pl.BlockSpec((TB, Dp), lambda i, u: (i, 0)),     # self feats
            pl.BlockSpec((TB, 1), lambda i, u: (i, 0)),      # 1/num_neighbors
            pl.BlockSpec((Dp, DOp), lambda i, u: (0, 0)),    # W_self^T (resident)
            pl.BlockSpec((Dp, DOp), lambda i, u: (0, 0)),    # W_agg^T  (resident)
        ],
        out_specs=pl.BlockSpec((TB, DOp), lambda i, u: (i, 0)),
        scratch_shapes=[pltpu.VMEM((TB, Dp), jnp.float32)],
        compiler_params=pltpu.CompilerParams(
            dimension_semantics=("parallel", "arbitrary"),
            vmem_limit_bytes=32 * 1024 * 1024,
        ),
    )(mask_p, embed_p, self_p, inv_p, w_self_p, w_agg_p)
    return out


# ---------------------------- GraphSage (glue) ----------------------------

class GraphSageJAX:
    """GraphSage with gcn=False, agg_func='MEAN' (the module defaults)."""

    def __init__(self, num_layers, input_size, out_size, raw_features,
                 adj_lists, gcn=False, agg_func='MEAN', sample_seed=1234):
        assert not gcn and agg_func == 'MEAN'
        # TODO(synk): gcn=True and agg_func='MAX' branches not implemented.
        self.num_layers = num_layers
        self.input_size = input_size
        self.out_size = out_size
        self.gcn = gcn
        self.agg_func = agg_func
        self.raw_features = raw_features
        self.adj_lists = adj_lists
        self._rng = random.Random(sample_seed)  # deterministic neighbor sampling

        # Deterministic xavier_uniform_ init (same shapes as the torch module),
        # plus padded, pre-transposed bf16 weight halves per layer.
        key = jax.random.PRNGKey(0)
        self.weights = []
        self._w_self_p = []
        self._w_agg_p = []
        for index in range(1, num_layers + 1):
            layer_size = out_size if index != 1 else input_size
            in_dim = layer_size if gcn else 2 * layer_size
            key, sub = jax.random.split(key)
            bound = float(np.sqrt(6.0 / (in_dim + out_size)))
            w = jax.random.uniform(sub, (out_size, in_dim),
                                   minval=-bound, maxval=bound,
                                   dtype=jnp.float32)
            self.weights.append(w)
            dp = _round_up(max(layer_size, LANE), LANE)
            dop = _round_up(max(out_size, LANE), LANE)
            w_self_t = jnp.transpose(w[:, :layer_size])   # (layer_in, out)
            w_agg_t = jnp.transpose(w[:, layer_size:])    # (layer_in, out)
            self._w_self_p.append(_pad2(w_self_t, dp, dop).astype(jnp.bfloat16))
            self._w_agg_p.append(_pad2(w_agg_t, dp, dop).astype(jnp.bfloat16))

    # ---- host-side graph bookkeeping (mirrors the reference) ----
    def _get_unique_neighs_list(self, nodes, num_sample=10):
        to_neighs = [self.adj_lists[int(node)] for node in nodes]
        if num_sample is not None:
            samp_neighs = [set(self._rng.sample(sorted(tn), num_sample))
                           if len(tn) >= num_sample else set(tn)
                           for tn in to_neighs]
        else:
            samp_neighs = [set(tn) for tn in to_neighs]
        samp_neighs = [sn | {nodes[i]} for i, sn in enumerate(samp_neighs)]
        unique_nodes_list = sorted(set.union(*samp_neighs))
        unique_nodes = {n: i for i, n in enumerate(unique_nodes_list)}
        return samp_neighs, unique_nodes, unique_nodes_list

    def _nodes_map(self, nodes, pre_neighs):
        layer_nodes, samp_neighs, layer_nodes_dict = pre_neighs
        assert len(samp_neighs) == len(nodes)
        return [layer_nodes_dict[x] for x in nodes]

    def _build_mean_agg_inputs(self, nodes, pre_hidden_embs, pre_rows, pre_neighs):
        """Dense 0/1 mask (bf16), exact 1/count (f32) and the embed matrix."""
        unique_nodes_list, samp_neighs, unique_nodes = pre_neighs
        assert len(nodes) == len(samp_neighs)
        assert all(nodes[i] in samp_neighs[i] for i in range(len(samp_neighs)))
        if not self.gcn:
            samp_neighs = [samp_neighs[i] - {nodes[i]}
                           for i in range(len(samp_neighs))]
        if pre_rows == len(unique_nodes):
            # Rows of the (padded) previous-layer output already follow the
            # unique-node ordering: use it directly, no slice / re-pad.
            embed_matrix = pre_hidden_embs
        else:
            idx = jnp.asarray(unique_nodes_list, dtype=jnp.int32)
            embed_matrix = pre_hidden_embs[idx]
        # TODO(synk): for real graphs replace this dense O(B*U) mask with
        # scalar-prefetched neighbor indices + in-kernel gather (P2).
        B, U = len(samp_neighs), len(unique_nodes)
        mask = np.zeros((B, U), dtype=np.float32)
        counts = np.zeros((B, 1), dtype=np.float32)
        for i, sn in enumerate(samp_neighs):
            counts[i, 0] = float(len(sn))
            for n in sn:
                mask[i, unique_nodes[n]] = 1.0
        # NOTE: reference PyTorch divides by zero (NaN) for isolated rows; we
        # intentionally emit agg = 0 instead (inv = 0).
        inv = np.where(counts > 0.0, 1.0 / np.maximum(counts, 1.0), 0.0)
        return (jnp.asarray(mask, dtype=jnp.bfloat16),
                jnp.asarray(inv.astype(np.float32)),
                embed_matrix)

    def forward(self, nodes_batch):
        lower_layer_nodes = list(nodes_batch)
        nodes_batch_layers = [(lower_layer_nodes,)]
        for _ in range(self.num_layers):
            sn, d, lower_layer_nodes = self._get_unique_neighs_list(lower_layer_nodes)
            nodes_batch_layers.insert(0, (lower_layer_nodes, sn, d))
        assert len(nodes_batch_layers) == self.num_layers + 1

        pre_hidden_embs = self.raw_features           # (N, input_size) f32
        pre_rows = int(self.raw_features.shape[0])    # logical row count
        for index in range(1, self.num_layers + 1):
            nb = nodes_batch_layers[index][0]
            pre_neighs = nodes_batch_layers[index - 1]
            mask, inv, embed_matrix = self._build_mean_agg_inputs(
                nb, pre_hidden_embs, pre_rows, pre_neighs)
            if index > 1:
                nb = self._nodes_map(nb, pre_neighs)
            self_feats = pre_hidden_embs[jnp.asarray(nb, dtype=jnp.int32)]
            # Padded bf16 (Bp, DOp) handoff between layers; padded rows/cols are 0.
            pre_hidden_embs = fused_sage_layer(
                mask, inv, embed_matrix, self_feats,
                self._w_self_p[index - 1], self._w_agg_p[index - 1])
            pre_rows = len(nodes_batch_layers[index][0])
        # Single slice + f32 cast after the final layer only.
        return pre_hidden_embs[:pre_rows, :self.out_size].astype(jnp.float32)


# ---------------------------- driver ----------------------------

if __name__ == "__main__":
    NUM_NODES, IN_SIZE, OUT_SIZE = 64, 32, 32
    NUM_LAYERS, BATCH, DEGREE = 2, 8, 12

    # Deterministic synthetic graph.
    g = random.Random(0)
    adj_lists = {}
    for n in range(NUM_NODES):
        others = [m for m in range(NUM_NODES) if m != n]
        adj_lists[n] = set(g.sample(others, DEGREE))

    # Deterministic raw node features.
    key = jax.random.PRNGKey(0)
    raw_features = jax.random.normal(key, (NUM_NODES, IN_SIZE), dtype=jnp.float32)

    model = GraphSageJAX(NUM_LAYERS, IN_SIZE, OUT_SIZE, raw_features, adj_lists)
    out = jax.block_until_ready(model.forward(list(range(BATCH))))

    # Fused-kernel sanity check against plain f32 jnp math.
    # (bf16 MXU inputs with f32 accumulation -> bf16-level tolerance.)
    B, U, D, DO = 8, 19, 32, 32
    km, ke, ks, kw = jax.random.split(jax.random.PRNGKey(1), 4)
    m = (jax.random.uniform(km, (B, U)) > 0.6).astype(jnp.float32)
    m = m.at[:, 0].set(1.0)                       # every row has >= 1 neighbor
    e = jax.random.normal(ke, (U, D), dtype=jnp.float32)
    s = jax.random.normal(ks, (B, D), dtype=jnp.float32)
    w = jax.random.normal(kw, (DO, 2 * D), dtype=jnp.float32) * 0.3
    cnt = m.sum(axis=1, keepdims=True)
    inv = (1.0 / jnp.maximum(cnt, 1.0)).astype(jnp.float32)
    dp = _round_up(D, LANE)
    dop = _round_up(DO, LANE)
    w_self_p = _pad2(jnp.transpose(w[:, :D]), dp, dop).astype(jnp.bfloat16)
    w_agg_p = _pad2(jnp.transpose(w[:, D:]), dp, dop).astype(jnp.bfloat16)
    got = fused_sage_layer(m, inv, e, s, w_self_p, w_agg_p)[:B, :DO].astype(jnp.float32)
    got = jax.block_until_ready(got)
    agg_ref = (m / cnt) @ e
    ref = jnp.maximum(jnp.concatenate([s, agg_ref], axis=1) @ jnp.transpose(w), 0.0)
    assert np.allclose(np.asarray(got), np.asarray(ref), rtol=5e-2, atol=1e-1), \
        float(np.max(np.abs(np.asarray(got) - np.asarray(ref))))

    assert out.shape == (BATCH, OUT_SIZE)
    assert bool(jnp.all(jnp.isfinite(out)))
    print("KERNEL_OK")
</pallas_src>

<mosaic_0001>
module attributes {stable_mosaic.version = 11 : i64} {
  func.func @_fused_sage_kernel(%arg0: i32, %arg1: i32, %arg2: memref<48x128xbf16, #tpu.memory_space<vmem>>, %arg3: memref<128x128xbf16, #tpu.memory_space<vmem>>, %arg4: memref<48x128xbf16, #tpu.memory_space<vmem>>, %arg5: memref<48x1xf32, #tpu.memory_space<vmem>>, %arg6: memref<128x128xbf16, #tpu.memory_space<vmem>>, %arg7: memref<128x128xbf16, #tpu.memory_space<vmem>>, %arg8: memref<48x128xbf16, #tpu.memory_space<vmem>>, %arg9: memref<48x128xf32, #tpu.memory_space<vmem>>) attributes {dimension_semantics = [#tpu.dimension_semantics<parallel>, #tpu.dimension_semantics<arbitrary>], iteration_bounds = array<i64: 1, 1>, scalar_prefetch = 0 : i64, scratch_operands = 1 : i64, tpu.core_type = #tpu.core_type<tc>, window_params = [{transform_indices = @transform_0, window_bounds = array<i64: 48, 128>}, {transform_indices = @transform_1, window_bounds = array<i64: 128, 128>}, {transform_indices = @transform_2, window_bounds = array<i64: 48, 128>}, {transform_indices = @transform_3, window_bounds = array<i64: 48, 1>}, {pipeline_mode = #tpu.pipeline_mode<synchronous>, transform_indices = @transform_4, window_bounds = array<i64: 128, 128>}, {pipeline_mode = #tpu.pipeline_mode<synchronous>, transform_indices = @transform_5, window_bounds = array<i64: 128, 128>}, {transform_indices = @transform_6, window_bounds = array<i64: 48, 128>}]} {
    %c0_i32 = arith.constant 0 : i32
    %0 = arith.cmpi eq, %arg1, %c0_i32 : i32
    %1 = arith.extui %0 : i1 to i32
    %c0_i32_0 = arith.constant 0 : i32
    %2 = arith.cmpi ne, %1, %c0_i32_0 : i32
    scf.if %2 {
      %cst_10 = arith.constant 0.000000e+00 : f32
      %12 = vector.broadcast %cst_10 : f32 to vector<48x128xf32>
      %c0_11 = arith.constant 0 : index
      %c0_12 = arith.constant 0 : index
      %13 = vector.load %arg9[%c0_11, %c0_12] : memref<48x128xf32, #tpu.memory_space<vmem>>, vector<48x128xf32>
      tpu.vector_store %arg9[%c0_11, %c0_12], %12 {strides = array<i32>} : memref<48x128xf32, #tpu.memory_space<vmem>>, vector<48x128xf32>,
    } else {
    }
    %c0 = arith.constant 0 : index
    %c0_1 = arith.constant 0 : index
    %3 = vector.load %arg9[%c0, %c0_1] : memref<48x128xf32, #tpu.memory_space<vmem>>, vector<48x128xf32>
    %c0_2 = arith.constant 0 : index
    %c0_3 = arith.constant 0 : index
    %4 = vector.load %arg2[%c0_2, %c0_3] : memref<48x128xbf16, #tpu.memory_space<vmem>>, vector<48x128xbf16>
    %c0_4 = arith.constant 0 : index
    %c0_5 = arith.constant 0 : index
    %5 = vector.load %arg3[%c0_4, %c0_5] : memref<128x128xbf16, #tpu.memory_space<vmem>>, vector<128x128xbf16>
    %cst = arith.constant dense<0.000000e+00> : vector<48x128xf32>
    %6 = tpu.matmul %4, %5, %cst {dimension_numbers = #tpu.dot_dimension_numbers<[1], [0], [0], [1], [0, 0, 1, 1], [], []>} : vector<48x128xbf16>, vector<128x128xbf16>, vector<48x128xf32> -> vector<48x128xf32>
    %7 = arith.addf %3, %6 : vector<48x128xf32>
    %c0_6 = arith.constant 0 : index
    %c0_7 = arith.constant 0 : index
    %8 = vector.load %arg9[%c0_6, %c0_7] : memref<48x128xf32, #tpu.memory_space<vmem>>, vector<48x128xf32>
    tpu.vector_store %arg9[%c0_6, %c0_7], %7 {strides = array<i32>} : memref<48x128xf32, #tpu.memory_space<vmem>>, vector<48x128xf32>,
    %c0_i32_8 = arith.constant 0 : i32
    %9 = arith.cmpi eq, %arg1, %c0_i32_8 : i32
    %10 = arith.extui %9 : i1 to i32
    %c0_i32_9 = arith.constant 0 : i32
    %11 = arith.cmpi ne, %10, %c0_i32_9 : i32
    scf.if %11 {
      %c0_10 = arith.constant 0 : index
      %c0_11 = arith.constant 0 : index
      %12 = vector.load %arg9[%c0_10, %c0_11] : memref<48x128xf32, #tpu.memory_space<vmem>>, vector<48x128xf32>
      %c0_12 = arith.constant 0 : index
      %c0_13 = arith.constant 0 : index
      %13 = vector.load %arg5[%c0_12, %c0_13] : memref<48x1xf32, #tpu.memory_space<vmem>>, vector<48x1xf32>
      %14 = vector.broadcast %13 : vector<48x1xf32> to vector<48x128xf32>
      %15 = arith.mulf %12, %14 : vector<48x128xf32>
      %16 = arith.truncf %15 : vector<48x128xf32> to vector<48x128xbf16>
      %c0_14 = arith.constant 0 : index
      %c0_15 = arith.constant 0 : index
      %17 = vector.load %arg4[%c0_14, %c0_15] : memref<48x128xbf16, #tpu.memory_space<vmem>>, vector<48x128xbf16>
      %c0_16 = arith.constant 0 : index
      %c0_17 = arith.constant 0 : index
      %18 = vector.load %arg6[%c0_16, %c0_17] : memref<128x128xbf16, #tpu.memory_space<vmem>>, vector<128x128xbf16>
      %cst_18 = arith.constant dense<0.000000e+00> : vector<48x128xf32>
      %19 = tpu.matmul %17, %18, %cst_18 {dimension_numbers = #tpu.dot_dimension_numbers<[1], [0], [0], [1], [0, 0, 1, 1], [], []>} : vector<48x128xbf16>, vector<128x128xbf16>, vector<48x128xf32> -> vector<48x128xf32>
      %c0_19 = arith.constant 0 : index
      %c0_20 = arith.constant 0 : index
      %20 = vector.load %arg7[%c0_19, %c0_20] : memref<128x128xbf16, #tpu.memory_space<vmem>>, vector<128x128xbf16>
      %cst_21 = arith.constant dense<0.000000e+00> : vector<48x128xf32>
      %21 = tpu.matmul %16, %20, %cst_21 {dimension_numbers = #tpu.dot_dimension_numbers<[1], [0], [0], [1], [0, 0, 1, 1], [], []>} : vector<48x128xbf16>, vector<128x128xbf16>, vector<48x128xf32> -> vector<48x128xf32>
      %22 = arith.addf %19, %21 : vector<48x128xf32>
      %cst_22 = arith.constant 0.000000e+00 : f32
      %23 = vector.broadcast %cst_22 : f32 to vector<48x128xf32>
      %24 = arith.maximumf %22, %23 : vector<48x128xf32>
      %25 = arith.truncf %24 : vector<48x128xf32> to vector<48x128xbf16>
      %c0_23 = arith.constant 0 : index
      %c0_24 = arith.constant 0 : index
      %26 = vector.load %arg8[%c0_23, %c0_24] : memref<48x128xbf16, #tpu.memory_space<vmem>>, vector<48x128xbf16>
      tpu.vector_store %arg8[%c0_23, %c0_24], %25 {strides = array<i32>} : memref<48x128xbf16, #tpu.memory_space<vmem>>, vector<48x128xbf16>,
    } else {
    }
    return
  }
  func.func @transform_0(%arg0: i32, %arg1: i32) -> (i32, i32) {
    %c0_i32 = arith.constant 0 : i32
    return %arg0, %arg1 : i32, i32
  }
  func.func @transform_1(%arg0: i32, %arg1: i32) -> (i32, i32) {
    %c0_i32 = arith.constant 0 : i32
    %c0_i32_0 = arith.constant 0 : i32
    return %arg1, %c0_i32 : i32, i32
  }
  func.func @transform_2(%arg0: i32, %arg1: i32) -> (i32, i32) {
    %c0_i32 = arith.constant 0 : i32
    %c0_i32_0 = arith.constant 0 : i32
    return %arg0, %c0_i32 : i32, i32
  }
  func.func @transform_3(%arg0: i32, %arg1: i32) -> (i32, i32) {
    %c0_i32 = arith.constant 0 : i32
    %c0_i32_0 = arith.constant 0 : i32
    return %arg0, %c0_i32 : i32, i32
  }
  func.func @transform_4(%arg0: i32, %arg1: i32) -> (i32, i32) {
    %c0_i32 = arith.constant 0 : i32
    %c0_i32_0 = arith.constant 0 : i32
    %c0_i32_1 = arith.constant 0 : i32
    return %c0_i32, %c0_i32_0 : i32, i32
  }
  func.func @transform_5(%arg0: i32, %arg1: i32) -> (i32, i32) {
    %c0_i32 = arith.constant 0 : i32
    %c0_i32_0 = arith.constant 0 : i32
    %c0_i32_1 = arith.constant 0 : i32
    return %c0_i32, %c0_i32_0 : i32, i32
  }
  func.func @transform_6(%arg0: i32, %arg1: i32) -> (i32, i32) {
    %c0_i32 = arith.constant 0 : i32
    %c0_i32_0 = arith.constant 0 : i32
    return %arg0, %c0_i32 : i32, i32
  }
}

</mosaic_0001>

<bundles_post_ra>
// kernel: tpu_custom_call.1
= control target key start
LH: loop header
LB: loop body
LE: loop exit
PB: predicated region body
PF: predicated region fallthrough
CT: control target
= control target key end

     0   :  { %11 = vsyncpa [#allocation4], 0  ;;  %s1086_s0 = inlined_call_operand.vmem [shape: bf16[48,128], index: 0, kind: input, shape index: {}]   ;;  %s1087_s1 = inlined_call_operand.hbm [shape: bf16[128,128], index: 1, kind: input, shape index: {}]   ;;  %s1088_s2 = inlined_call_operand.vmem [shape: bf16[48,128], index: 2, kind: input, shape index: {}]   ;;  %s1089_s3 = inlined_call_operand.vmem [shape: f32[48,1], index: 3, kind: input, shape index: {}]   ;;  %s1090_s4 = inlined_call_operand.hbm [shape: bf16[128,128], index: 4, kind: input, shape index: {}]   ;;  %s1091_s5 = inlined_call_operand.hbm [shape: bf16[128,128], index: 5, kind: input, shape index: {}]   ;;  %s1092_s6 = inlined_call_operand.hbm [shape: bf16[48,128], index: 6, kind: output, shape index: {}]  }
   0x1   :  { %12 = vsyncpa [#allocation7], 0 }
   0x2   :  { %13 = vsyncpa [#allocation5], 0  ;;  %s932_s21 = smov [#allocation6]   ;;  %s933_s23 = smov [#allocation3]  }
   0x3   :  { %s37_s22 = sshll.u32 %s932_s21, 4  ;;  %s21_s24 = sshll.u32 %s933_s23, 4  ;;  %s38_s22 = int_to_ptr.vmem [resolvable:$true] %s37_s22  ;;  %s22_s24 = int_to_ptr.vmem [resolvable:$true] %s21_s24 }
   0x4   :  { %s854_s25 = scalar_lea.vmem %s38_s22, 1024  ;;  %p859_p1 = scmp.lt.s32.totalorder %s38_s22, %s38_s22 }
   0x5   :  { %p855_p0 = scmp.ne.s32.totalorder %s38_s22, %s854_s25  ;;  %p860_p2 = scmp.lt.s32.totalorder %s854_s25, %s854_s25 }
   0x7   :  { %p861_p3 = por %p860_p2, %p859_p1 }
   0x9   :  { %p862_p4 = pnand %p861_p3, %p855_p0 }
   0xb   :  { %865 = shalt.err (!%p862_p4)
}
   0xc   :  { %s934_s26 = smov 64   ;;  %s935_s27 = smov 4  }
   0xd   :  { %43 = dma.hbm_to_vmem [thread:$0]  %s1090_s4, 1024, %s38_s22, [#allocation7], %s934_s26, %s934_s26, %s935_s27  }
   0xe   :  { %s874_s30 = scalar_lea.vmem %s22_s24, 1024  ;;  %p879_p6 = scmp.lt.s32.totalorder %s22_s24, %s22_s24 }
   0xf   :  { %p875_p5 = scmp.ne.s32.totalorder %s22_s24, %s874_s30  ;;  %p880_p7 = scmp.lt.s32.totalorder %s874_s30, %s874_s30 }
  0x11   :  { %p881_p8 = por %p880_p7, %p879_p6 }
  0x13   :  { %p882_p9 = pnand %p881_p8, %p875_p5 }
  0x15   :  { %885 = shalt.err (!%p882_p9)
}
  0x16   :  { %27 = dma.hbm_to_vmem [thread:$0]  %s1087_s1, 1024, %s22_s24, [#allocation4], %s934_s26, %s934_s26, %s935_s27  }
  0x17   :  { %s936_s9 = smov [#allocation8]  }
  0x18   :  { %s49_s10 = sshll.u32 %s936_s9, 4  ;;  %s50_s10 = int_to_ptr.vmem [resolvable:$true] %s49_s10 }
  0x19   :  { %s894_s11 = scalar_lea.vmem %s50_s10, 1024  ;;  %p899_p11 = scmp.lt.s32.totalorder %s50_s10, %s50_s10 }
  0x1a   :  { %p895_p10 = scmp.ne.s32.totalorder %s50_s10, %s894_s11  ;;  %p900_p12 = scmp.lt.s32.totalorder %s894_s11, %s894_s11 }
  0x1c   :  { %p901_p13 = por %p900_p12, %p899_p11 }
  0x1e   :  { %p902_p0 = pnand %p901_p13, %p895_p10 }
  0x20   :  { %905 = shalt.err (!%p902_p0)
}
  0x21   :  { %55 = dma.hbm_to_vmem [thread:$0]  %s1091_s5, 1024, %s50_s10, [#allocation7], %s934_s26, %s934_s26, %s935_s27  }
  0x22   :  { %926 = dma.done.wait [#allocation4], 1024  }
  0x23   :  { %927 = vsyncadd [#allocation4], 4294966272 }
  0x24   :  { %928 = dma.done.wait [#allocation7], 2048  }
  0x25   :  { %929 = vsyncadd [#allocation7], 4294965248  ;;  %v937_v0 = vmov 0.0   ;;  %vm938_vm0 = vmmov 0   ;;  %v939_v1 = vmov 0   ;;  %v816_v2 = vld [vmem:[#allocation3 + $0x38] sm:$0xff]  }
  0x26   :  { %705 = vmatprep.subr.bf16.mxu0 %v937_v0  ;;  %721 = vmatprep.mubr.msk.bf16.mxu0 %vm938_vm0, %v937_v0  ;;  %v817_v3 = vld [vmem:[#allocation3 + $0x30] sm:$0xff]   ;;  %v818_v4 = vld [vmem:[#allocation3 + $0x28] sm:$0xff]   ;;  %v819_v5 = vld [vmem:[#allocation3 + $0x20] sm:$0xff]  }
  0x27   :  { %814 = vset.pattern.permute.xlu0 %v939_v1  ;;  %815 = vset.pattern.permute.xlu1 %v939_v1  ;;  %v248_v6 = vld [vmem:[%s1089_s3] sm:$0xff]  ;;  %v820_v7 = vld [vmem:[#allocation3 + $0x18] sm:$0xff]   ;;  %v249_v8 = vld [vmem:[%s1089_s3 + $0x8] sm:$0xff] }
  0x28   :  { %733 = vmatprep.subr.bf16.mxu1 %v937_v0  ;;  %749 = vmatprep.mubr.msk.bf16.mxu1 %vm938_vm0, %v937_v0  ;;  %v250_v9 = vld [vmem:[%s1089_s3 + $0x10] sm:$0xff]  ;;  %v827_v10 = vld [vmem:[#allocation8 + $0x38] sm:$0xff]   ;;  %v252_v14 = vld [vmem:[%s1089_s3 + $0x20] sm:$0xff] }
  0x29   :  { %706 = vmatpush3.bf16.msra.mxu0 %v816_v2  ;;  %256 = vperm.xlu0 %814, %v248_v6   ;;  %v251_v11 = vld [vmem:[%s1089_s3 + $0x18] sm:$0xff]  ;;  %v829_v12 = vld [vmem:[#allocation8 + $0x30] sm:$0xff]   ;;  %v253_v15 = vld [vmem:[%s1089_s3 + $0x28] sm:$0xff] }
  0x2a   :  { %707 = vmatprep.subr.bf16.mxu0 %v937_v0  ;;  %266 = vperm.xlu1 %815, %v250_v9   ;;  %v821_v13 = vld [vmem:[#allocation3 + $0x10] sm:$0xff]   ;;  %v831_v16 = vld [vmem:[#allocation8 + $0x28] sm:$0xff]   ;;  %v833_v18 = vld [vmem:[#allocation8 + $0x20] sm:$0xff]  }
  0x2b   :  { %734 = vmatpush3.bf16.msra.mxu1 %v827_v10  ;;  %v822_v17 = vld [vmem:[#allocation3 + $0x8] sm:$0xff]   ;;  %v823_v19 = vld [vmem:[#allocation3] sm:$0xff]   ;;  %v835_v20 = vld [vmem:[#allocation8 + $0x18] sm:$0xff]  }
  0x2c   :  { %735 = vmatprep.subr.bf16.mxu1 %v937_v0  ;;  %v824_v21 = vld [vmem:[%s1086_s0] sm:$0xff]   ;;  %v828_v22 = vld [vmem:[#allocation6 + $0x38] sm:$0xff]   ;;  %v837_v23 = vld [vmem:[#allocation8 + $0x10] sm:$0xff]  }
  0x2d   :  { %708 = vmatpush3.bf16.msra.mxu0 %v817_v3  ;;  %261 = vperm.xlu0 %814, %v249_v8   ;;  %v830_v24 = vld [vmem:[#allocation6 + $0x30] sm:$0xff]   ;;  %v825_v25 = vld [vmem:[%s1086_s0 + $0x8] sm:$0xff]   ;;  %v834_v27 = vld [vmem:[#allocation6 + $0x20] sm:$0xff]  }
  0x2e   :  { %709 = vmatprep.subr.bf16.mxu0 %v937_v0  ;;  %271 = vperm.xlu1 %815, %v251_v11   ;;  %v832_v26 = vld [vmem:[#allocation6 + $0x28] sm:$0xff]   ;;  %v826_v28 = vld [vmem:[%s1086_s0 + $0x10] sm:$0xff]   ;;  %v836_v29 = vld [vmem:[#allocation6 + $0x18] sm:$0xff]  }
  0x2f   :  { %736 = vmatpush3.bf16.msra.mxu1 %v829_v12  ;;  %v838_v30 = vld [vmem:[#allocation6 + $0x10] sm:$0xff]   ;;  %v839_v31 = vld [vmem:[#allocation8 + $0x8] sm:$0xff]   ;;  %v841_v33 = vld [vmem:[#allocation8] sm:$0xff]  }
  0x30   :  { %737 = vmatprep.subr.bf16.mxu1 %v937_v0  ;;  %v840_v32 = vld [vmem:[#allocation6 + $0x8] sm:$0xff]   ;;  %v842_v34 = vld [vmem:[#allocation6] sm:$0xff]   ;;  %v845_v1 = vld [vmem:[%s1088_s2 + $0x10] sm:$0xff]  }
  0x31   :  { %710 = vmatpush3.bf16.msra.mxu0 %v818_v4  ;;  %276 = vperm.xlu0 %814, %v252_v14   ;;  %v843_v35 = vld [vmem:[%s1088_s2] sm:$0xff]   ;;  %v844_v63 = vld [vmem:[%s1088_s2 + $0x8] sm:$0xff]   ;;  %s940_s2 = smov [#allocation9]  }
  0x32   :  { %711 = vmatprep.subr.bf16.mxu0 %v937_v0  ;;  %281 = vperm.xlu1 %815, %v253_v15   ;;  %s600_s11 = sshll.u32 %s940_s2, 4  ;;  %s601_s11 = int_to_ptr.vmem [resolvable:$true] %s600_s11 }
  0x33   :  { %738 = vmatpush3.bf16.msra.mxu1 %v831_v16  ;;  %s906_s4 = scalar_lea.vmem %s601_s11, 384  ;;  %p911_p2 = scmp.lt.s32.totalorder %s601_s11, %s601_s11 }
  0x34   :  { %739 = vmatprep.subr.bf16.mxu1 %v937_v0  ;;  %p907_p1 = scmp.ne.s32.totalorder %s601_s11, %s906_s4  ;;  %p912_p3 = scmp.lt.s32.totalorder %s906_s4, %s906_s4 }
  0x35   :  { %712 = vmatpush3.bf16.msra.mxu0 %v819_v5 }
  0x36   :  { %713 = vmatprep.subr.bf16.mxu0 %v937_v0  ;;  %p913_p4 = por %p912_p3, %p911_p2 }
  0x37   :  { %740 = vmatpush3.bf16.msra.mxu1 %v833_v18 }
  0x38   :  { %741 = vmatprep.subr.bf16.mxu1 %v937_v0  ;;  %p914_p5 = pnand %p913_p4, %p907_p1 }
  0x39   :  { %714 = vmatpush3.bf16.msra.mxu0 %v820_v7 }
  0x3a   :  { %715 = vmatprep.subr.bf16.mxu0 %v937_v0 }
  0x3b   :  { %742 = vmatpush3.bf16.msra.mxu1 %v835_v20 }
  0x3c   :  { %743 = vmatprep.subr.bf16.mxu1 %v937_v0 }
  0x3d   :  { %716 = vmatpush3.bf16.msra.mxu0 %v821_v13 }
  0x3e   :  { %717 = vmatprep.subr.bf16.mxu0 %v937_v0 }
  0x3f   :  { %744 = vmatpush3.bf16.msra.mxu1 %v837_v23 }
  0x40   :  { %745 = vmatprep.subr.bf16.mxu1 %v937_v0 }
  0x41   :  { %718 = vmatpush3.bf16.msra.mxu0 %v822_v17 }
  0x42   :  { %719 = vmatprep.subr.bf16.mxu0 %v937_v0 }
  0x43   :  { %746 = vmatpush3.bf16.msra.mxu1 %v839_v31 }
  0x44   :  { %747 = vmatprep.subr.bf16.mxu1 %v937_v0 }
  0x45   :  { %720 = vmatpush3.bf16.msra.mxu0 %v823_v19 }
  0x46   :  { %761 = vmatprep.subr.bf16.mxu0 %v937_v0 }
  0x47   :  { %748 = vmatpush3.bf16.msra.mxu1 %v841_v33 }
  0x48   :  { %722 = vmatmul.mubr.bf16.vlgmr.msra.gmra.mxu0 %v824_v21  ;;  %789 = vmatprep.subr.bf16.mxu1 %v937_v0 }
  0x49   :  { %725 = vmatprep.mubr.msk.bf16.mxu0 %vm938_vm0, %v937_v0  ;;  %762 = vmatpush3.bf16.msra.mxu0 %v828_v22 }
  0x4a   :  { %763 = vmatprep.subr.bf16.mxu0 %v937_v0 }
  0x4d   :  { %764 = vmatpush3.bf16.msra.mxu0 %v830_v24 }
  0x4e   :  { %765 = vmatprep.subr.bf16.mxu0 %v937_v0 }
  0x50   :  { %726 = vmatmul.mubr.bf16.gmra.mxu0 %v825_v25 }
  0x51   :  { %729 = vmatprep.mubr.msk.bf16.mxu0 %vm938_vm0, %v937_v0  ;;  %766 = vmatpush3.bf16.msra.mxu0 %v832_v26 }
  0x52   :  { %767 = vmatprep.subr.bf16.mxu0 %v937_v0 }
  0x55   :  { %768 = vmatpush3.bf16.msra.mxu0 %v834_v27 }
  0x56   :  { %769 = vmatprep.subr.bf16.mxu0 %v937_v0 }
  0x58   :  { %730 = vmatmul.mubr.bf16.gmra.mxu0 %v826_v28 }
  0x59   :  { %770 = vmatpush3.bf16.msra.mxu0 %v836_v29  ;;  %777 = vmatprep.mubr.msk.bf16.mxu0 %vm938_vm0, %v937_v0 }
  0x5a   :  { %771 = vmatprep.subr.bf16.mxu0 %v937_v0 }
  0x5d   :  { %772 = vmatpush3.bf16.msra.mxu0 %v838_v30 }
  0x5e   :  { %773 = vmatprep.subr.bf16.mxu0 %v937_v0 }
  0x61   :  { %774 = vmatpush3.bf16.msra.mxu0 %v840_v32 }
  0x62   :  { %775 = vmatprep.subr.bf16.mxu0 %v937_v0 }
  0x65   :  { %776 = vmatpush3.bf16.msra.mxu0 %v842_v34 }
  0x68   :  { %778 = vmatmul.mubr.bf16.vlgmr.msra.gmra.mxu0 %v843_v35 }
  0xa4   :  { %v257_v36 = vpop.permute.xlu0 %256 }
  0xa5   :  { %v267_v39 = vpop.permute.xlu1 %266 }
  0xa8   :  { %v262_v40 = vpop.permute.xlu0 %261 }
  0xa9   :  { %v272_v48 = vpop.permute.xlu1 %271 }
  0xac   :  { %v277_v56 = vpop.permute.xlu0 %276 }
  0xad   :  { %v282_v57 = vpop.permute.xlu1 %281 }
 0x108   :  { %v204_v37 = vpop.f32.mrf.mxu0 }
 0x109   :  { %v284_v42 = vmul.f32 %v257_v36, %v204_v37 }
 0x10a   :  { %v723_v38 = vpop.f32.mrf.mxu0 }
 0x10c   :  { %v207_v41 = vpop.f32.mrf.mxu0 }
 0x10d   :  { %v285_v43 = vmul.f32 %v262_v40, %v207_v41 }
 0x10e   :  { %v724_v44 = vpop.f32.mrf.mxu0 }
 0x10f   :  { %v290_v45 = vpack.c.bf16 %v285_v43, %v284_v42 }
 0x110   :  { %v212_v46 = vpop.f32.mrf.mxu0 }
 0x111   :  { %750 = vmatmul.mubr.bf16.vlgmr.msra.gmra.mxu1 %v290_v45  ;;  %v286_v49 = vmul.f32 %v267_v39, %v212_v46 }
 0x112   :  { %797 = vmatpush3.bf16.msra.mxu1 %v828_v22  ;;  %v727_v47 = vpop.f32.mrf.mxu0  ;;  %753 = vmatprep.mubr.msk.bf16.mxu1 %vm938_vm0, %v937_v0 }
 0x113   :  { %790 = vmatprep.subr.bf16.mxu1 %v937_v0 }
 0x114   :  { %v215_v50 = vpop.f32.mrf.mxu0 }
 0x115   :  { %v287_v51 = vmul.f32 %v272_v48, %v215_v50 }
 0x116   :  { %798 = vmatpush3.bf16.msra.mxu1 %v830_v24  ;;  %v728_v52 = vpop.f32.mrf.mxu0 }
 0x117   :  { %v291_v53 = vpack.c.bf16 %v287_v51, %v286_v49  ;;  %791 = vmatprep.subr.bf16.mxu1 %v937_v0 }
 0x118   :  { %v220_v54 = vpop.f32.mrf.mxu0 }
 0x119   :  { %754 = vmatmul.mubr.bf16.gmra.mxu1 %v291_v53  ;;  %v288_v59 = vmul.f32 %v277_v56, %v220_v54 }
 0x11a   :  { %799 = vmatpush3.bf16.msra.mxu1 %v832_v26  ;;  %v731_v55 = vpop.f32.mrf.mxu0  ;;  %757 = vmatprep.mubr.msk.bf16.mxu1 %vm938_vm0, %v937_v0 }
 0x11b   :  { %792 = vmatprep.subr.bf16.mxu1 %v937_v0 }
 0x11c   :  { %v223_v58 = vpop.f32.mrf.mxu0 }
 0x11d   :  { %v289_v60 = vmul.f32 %v282_v57, %v223_v58 }
 0x11e   :  { %800 = vmatpush3.bf16.msra.mxu1 %v834_v27  ;;  %v732_v61 = vpop.f32.mrf.mxu0 }
 0x11f   :  { %v292_v62 = vpack.c.bf16 %v289_v60, %v288_v59  ;;  %793 = vmatprep.subr.bf16.mxu1 %v937_v0 }
 0x121   :  { %758 = vmatmul.mubr.bf16.gmra.mxu1 %v292_v62 }
 0x122   :  { %801 = vmatpush3.bf16.msra.mxu1 %v836_v29  ;;  %781 = vmatprep.mubr.msk.bf16.mxu1 %vm938_vm0, %v937_v0 }
 0x123   :  { %794 = vmatprep.subr.bf16.mxu1 %v937_v0 }
 0x126   :  { %802 = vmatpush3.bf16.msra.mxu1 %v838_v30 }
 0x127   :  { %795 = vmatprep.subr.bf16.mxu1 %v937_v0 }
 0x128   :  { %v536_v2 = vpop.f32.mrf.mxu0 }
 0x12a   :  { %803 = vmatpush3.bf16.msra.mxu1 %v840_v32  ;;  %v779_v3 = vpop.f32.mrf.mxu0 }
 0x12b   :  { %796 = vmatprep.subr.bf16.mxu1 %v937_v0 }
 0x12c   :  { %v539_v4 = vpop.f32.mrf.mxu0 }
 0x12e   :  { %804 = vmatpush3.bf16.msra.mxu1 %v842_v34  ;;  %v780_v5 = vpop.f32.mrf.mxu0 }
 0x131   :  { %782 = vmatmul.mubr.bf16.vlgmr.msra.gmra.mxu1 %v844_v63 }
 0x132   :  { %785 = vmatprep.mubr.msk.bf16.mxu1 %vm938_vm0, %v937_v0 }
 0x139   :  { %786 = vmatmul.mubr.bf16.gmra.mxu1 %v845_v1 }
 0x1d1   :  { %v413_v6 = vpop.f32.mrf.mxu1 }
 0x1d2   :  { %v537_v8 = vadd.f32 %v536_v2, %v413_v6 }
 0x1d3   :  { %v751_v7 = vpop.f32.mrf.mxu1 }
 0x1d4   :  { %v559_v12 = vmax.f32 %v537_v8, 0.0 }
 0x1d5   :  { %v416_v9 = vpop.f32.mrf.mxu1 }
 0x1d6   :  { %v540_v10 = vadd.f32 %v539_v4, %v416_v9 }
 0x1d7   :  { %v752_v11 = vpop.f32.mrf.mxu1 }
 0x1d8   :  { %v560_v13 = vmax.f32 %v540_v10, 0.0 }
 0x1d9   :  { %v421_v14 = vpop.f32.mrf.mxu1 }
 0x1da   :  { %v658_v15 = vpack.c.bf16 %v560_v13, %v559_v12 }
 0x1db   :  { %v755_v0 = vpop.f32.mrf.mxu1 }
 0x1dc   :  { %659 = vst [vmem:[#allocation9] sm:$0xff] %v658_v15  }
 0x1dd   :  { %v424_v16 = vpop.f32.mrf.mxu1 }
 0x1df   :  { %v756_v17 = vpop.f32.mrf.mxu1 }
 0x1e1   :  { %v429_v18 = vpop.f32.mrf.mxu1 }
 0x1e3   :  { %v759_v19 = vpop.f32.mrf.mxu1 }
 0x1e5   :  { %v432_v20 = vpop.f32.mrf.mxu1 }
 0x1e7   :  { %v760_v21 = vpop.f32.mrf.mxu1 }
 0x1f1   :  { %v544_v22 = vpop.f32.mrf.mxu1 }
 0x1f2   :  { %v545_v24 = vadd.f32 %v544_v22, %v421_v14 }
 0x1f3   :  { %v783_v23 = vpop.f32.mrf.mxu1 }
 0x1f4   :  { %v561_v28 = vmax.f32 %v545_v24, 0.0 }
 0x1f5   :  { %v547_v25 = vpop.f32.mrf.mxu1 }
 0x1f6   :  { %v548_v26 = vadd.f32 %v547_v25, %v424_v16 }
 0x1f7   :  { %v784_v27 = vpop.f32.mrf.mxu1 }
 0x1f8   :  { %v562_v29 = vmax.f32 %v548_v26, 0.0 }
 0x1f9   :  { %v552_v30 = vpop.f32.mrf.mxu1 }
 0x1fa   :  { %v663_v31 = vpack.c.bf16 %v562_v29, %v561_v28  ;;  %v553_v33 = vadd.f32 %v552_v30, %v429_v18 }
 0x1fb   :  { %v787_v32 = vpop.f32.mrf.mxu1 }
 0x1fc   :  { %670 = vst [vmem:[#allocation9 + $0x8] sm:$0xff] %v663_v31   ;;  %v563_v37 = vmax.f32 %v553_v33, 0.0 }
 0x1fd   :  { %v555_v34 = vpop.f32.mrf.mxu1 }
 0x1fe   :  { %v556_v35 = vadd.f32 %v555_v34, %v432_v20 }
 0x1ff   :  { %v788_v36 = vpop.f32.mrf.mxu1 }
 0x200   :  { %v564_v38 = vmax.f32 %v556_v35, 0.0 }
 0x202   :  { %v668_v39 = vpack.c.bf16 %v564_v38, %v563_v37 }
 0x204   :  { %671 = vst [vmem:[#allocation9 + $0x10] sm:$0xff] %v668_v39  }
 0x205   :  { %917 = shalt.err (!%p914_p5)
}
 0x206   :  { %606 = dma.vmem_to_hbm [thread:$0]  %s601_s11, 384, %s1092_s6, [#allocation5], %s934_s26, %s934_s26, %s935_s27  }
 0x207   :  { %930 = dma.done.wait [#allocation5], 384  }
 0x208   :  { %931 = vsyncadd [#allocation5], 4294966912 }
 0x209   :  { %610 = vsyncpa [#allocation4], 1 }
 0x20a   :  { %611 = vsyncpa [#allocation7], 1 }
 0x20b   :  { %612 = vsyncpa [#allocation5], 1 }

</bundles_post_ra>
